<compile_context>
chip_gen: v7x
topology: tpu7x:2x2x1
jax: 0.10.0
libtpu: 0.0.40
codegen_flags: <defaults>
</compile_context>

<pallas_src>
import functools

import jax
import jax.numpy as jnp
from jax import lax
from jax.experimental import pallas as pl
from jax.experimental.pallas import tpu as pltpu


def _lstm_net_kernel(x_ref, wih_ref, whh_ref, bias_ref, wout_ref, bout_ref,
                     h0_ref, c0_ref,
                     y_ref, hn_ref, cn_ref,
                     xp_ref, hs_ref,
                     *, batch, seq_len, n_features, hidden):
    """Whole myLSTM_Net forward in a single kernel invocation.

    x_ref:    (B, T, F)   raw batch-first input
    wih_ref:  (F, 4H)     W_ih^T with g-gate columns pre-scaled by 2
    whh_ref:  (H, 4H)     W_hh^T with g-gate columns pre-scaled by 2
    bias_ref: (1, 4H)     (b_ih + b_hh) with g slice pre-scaled by 2
    wout_ref: (H, 1)      output head weight (transposed)
    bout_ref: (1, 1)      output head bias
    h0_ref/c0_ref: (B, H) initial state
    y_ref:    (B, T, 1)   output sequence
    hn_ref/cn_ref: (1, B, H) final state
    xp_ref:   (T, B, 4H)  VMEM scratch: hoisted input projection (time-major)
    hs_ref:   (T, B, H)   VMEM scratch: hidden state per step (never hits HBM)
    """
    B, T, F, H = batch, seq_len, n_features, hidden

    # ---------------- hoisted input projection (off the serial chain) -------
    x_flat = x_ref[...].reshape(B * T, F)                      # b-major rows
    xp = jnp.dot(x_flat, wih_ref[...],
                 preferred_element_type=jnp.float32) + bias_ref[...]  # (B*T,4H)
    # Reorder to time-major into the VMEM scratch with static slices/stores
    # (pre-loop, cheap, avoids any in-kernel transpose lowering).
    for t in range(T):
        rows = [xp[b * T + t: b * T + t + 1, :] for b in range(B)]
        xp_ref[t] = jnp.concatenate(rows, axis=0)              # (B, 4H)

    whh = whh_ref[...]                                         # resident (H, 4H)

    # ---------------- serial LSTM recurrence, (h, c) carried in vregs -------
    def step(t, carry):
        h, c = carry
        # gates (B, 4H) in PyTorch order [i, f, g, o]; g columns are 2x-scaled.
        z = xp_ref[t] + jnp.dot(h, whh, preferred_element_type=jnp.float32)
        s = jax.nn.sigmoid(z)                                  # ONE EUP push
        i_g = s[:, 0 * H:1 * H]
        f_g = s[:, 1 * H:2 * H]
        g_g = 2.0 * s[:, 2 * H:3 * H] - 1.0                    # tanh(g) via VPU
        o_g = s[:, 3 * H:4 * H]
        c_new = f_g * c + i_g * g_g
        h_new = o_g * jnp.tanh(c_new)                          # second EUP push
        hs_ref[t] = h_new
        return (h_new, c_new)

    h_n, c_n = lax.fori_loop(0, T, step, (h0_ref[...], c0_ref[...]),
                             unroll=True)
    hn_ref[0] = h_n                                            # written once
    cn_ref[0] = c_n

    # ---------------- fused Linear(H, 1) head + (T,B)->(B,T) reorder --------
    hs = hs_ref[...]                                           # (T, B, H)
    wout = wout_ref[...]                                       # (H, 1)
    bout = bout_ref[...]                                       # (1, 1)
    for b in range(B):
        y_b = jnp.dot(hs[:, b, :], wout,
                      preferred_element_type=jnp.float32) + bout   # (T, 1)
        y_ref[b] = y_b


@jax.jit
def lstm_net_forward(x, params, h0, c0):
    """Mirror of myLSTM_Net.forward.

    x:  (B, T, F) batch_first input
    h0, c0: (1, B, H) (as produced by init_hidden)
    returns (y, (h_n, c_n)) with y: (B, T, 1), h_n/c_n: (1, B, H)
    """
    w_ih, w_hh, b_ih, b_hh, w_out, b_out = params
    B, T, F = x.shape
    H = w_hh.shape[1]
    f32 = jnp.float32

    # Weight prep (x-independent, tiny; would normally be pre-transformed once).
    # Scale the g-gate block by 2 so tanh(z) = 2*sigmoid(2z) - 1 can reuse the
    # single full-width sigmoid inside the kernel.
    gate_scale = jnp.concatenate([jnp.ones((2 * H,), f32),
                                  jnp.full((H,), 2.0, f32),
                                  jnp.ones((H,), f32)])
    wih_t = w_ih.astype(f32).T * gate_scale                    # (F, 4H)
    whh_t = w_hh.astype(f32).T * gate_scale                    # (H, 4H)
    bias = ((b_ih + b_hh).astype(f32) * gate_scale)[None, :]   # (1, 4H)
    wout_t = w_out.astype(f32).T                               # (H, 1)
    bout = b_out.astype(f32).reshape(1, 1)                     # (1, 1)
    h0_2d = h0[0].astype(f32)                                  # (B, H)
    c0_2d = c0[0].astype(f32)                                  # (B, H)

    kernel = functools.partial(_lstm_net_kernel,
                               batch=B, seq_len=T, n_features=F, hidden=H)

    vmem = pl.BlockSpec(memory_space=pltpu.MemorySpace.VMEM)
    y, h_n, c_n = pl.pallas_call(
        kernel,
        out_shape=(
            jax.ShapeDtypeStruct((B, T, 1), f32),              # y
            jax.ShapeDtypeStruct((1, B, H), f32),              # h_n
            jax.ShapeDtypeStruct((1, B, H), f32),              # c_n
        ),
        in_specs=[vmem] * 8,
        out_specs=(vmem, vmem, vmem),
        scratch_shapes=[
            pltpu.VMEM((T, B, 4 * H), f32),                    # x projection
            pltpu.VMEM((T, B, H), f32),                        # hidden sequence
        ],
    )(x.astype(f32), wih_t, whh_t, bias, wout_t, bout, h0_2d, c0_2d)

    return y, (h_n, c_n)


def _reference_forward(x, params, h0, c0):
    """Pure-JAX reference (lax.scan LSTM) for verification."""
    w_ih, w_hh, b_ih, b_hh, w_out, b_out = params
    H = w_hh.shape[1]
    x = x.astype(jnp.float32)

    def step(carry, x_t):
        h, c = carry
        gates = x_t @ w_ih.T + h @ w_hh.T + b_ih + b_hh
        i = jax.nn.sigmoid(gates[:, 0 * H:1 * H])
        f = jax.nn.sigmoid(gates[:, 1 * H:2 * H])
        g = jnp.tanh(gates[:, 2 * H:3 * H])
        o = jax.nn.sigmoid(gates[:, 3 * H:4 * H])
        c_new = f * c + i * g
        h_new = o * jnp.tanh(c_new)
        return (h_new, c_new), h_new

    (h_n, c_n), hs = jax.lax.scan(step, (h0[0], c0[0]),
                                  jnp.transpose(x, (1, 0, 2)))
    hs = jnp.transpose(hs, (1, 0, 2))                          # (B, T, H)
    y = hs @ w_out.T + b_out
    return y, (h_n[None], c_n[None])


def _xavier_normal(key, shape):
    # deterministic stand-in for torch.nn.init.xavier_normal_ on (1, B, H)
    fan_in, fan_out = shape[-2], shape[-1]
    std = (2.0 / (fan_in + fan_out)) ** 0.5
    return std * jax.random.normal(key, shape, dtype=jnp.float32)


if __name__ == "__main__":
    B, T, F, H = 2, 8, 8, 32   # batch, seq, n_features=8, hidden_size

    key = jax.random.PRNGKey(0)
    k_x, k_wih, k_whh, k_bih, k_bhh, k_wo, k_bo, k_h0, k_c0 = jax.random.split(key, 9)

    # PyTorch LSTM / Linear default init: U(-1/sqrt(H), 1/sqrt(H))
    s = 1.0 / (H ** 0.5)
    w_ih = jax.random.uniform(k_wih, (4 * H, F), jnp.float32, -s, s)
    w_hh = jax.random.uniform(k_whh, (4 * H, H), jnp.float32, -s, s)
    b_ih = jax.random.uniform(k_bih, (4 * H,), jnp.float32, -s, s)
    b_hh = jax.random.uniform(k_bhh, (4 * H,), jnp.float32, -s, s)
    w_out = jax.random.uniform(k_wo, (1, H), jnp.float32, -s, s)
    b_out = jax.random.uniform(k_bo, (1,), jnp.float32, -s, s)
    params = (w_ih, w_hh, b_ih, b_hh, w_out, b_out)

    # self.hidden from init_hidden(): xavier_normal_ on (1, B, H)
    h0 = _xavier_normal(k_h0, (1, B, H))
    c0 = _xavier_normal(k_c0, (1, B, H))

    x = jax.random.normal(k_x, (B, T, F), dtype=jnp.float32)

    y, (h_n, c_n) = lstm_net_forward(x, params, h0, c0)
    jax.block_until_ready((y, h_n, c_n))

    y_ref, (h_ref, c_ref) = _reference_forward(x, params, h0, c0)
    assert y.shape == (B, T, 1) and h_n.shape == (1, B, H) and c_n.shape == (1, B, H)
    assert jnp.allclose(y, y_ref, atol=1e-5, rtol=1e-5)
    assert jnp.allclose(h_n, h_ref, atol=1e-5, rtol=1e-5)
    assert jnp.allclose(c_n, c_ref, atol=1e-5, rtol=1e-5)

    print("KERNEL_OK")
</pallas_src>

<mosaic_0001>
module attributes {stable_mosaic.version = 11 : i64} {
  func.func @_lstm_net_kernel(%arg0: memref<2x8x8xf32, #tpu.memory_space<vmem>>, %arg1: memref<8x128xf32, #tpu.memory_space<vmem>>, %arg2: memref<32x128xf32, #tpu.memory_space<vmem>>, %arg3: memref<1x128xf32, #tpu.memory_space<vmem>>, %arg4: memref<32x1xf32, #tpu.memory_space<vmem>>, %arg5: memref<1x1xf32, #tpu.memory_space<vmem>>, %arg6: memref<2x32xf32, #tpu.memory_space<vmem>>, %arg7: memref<2x32xf32, #tpu.memory_space<vmem>>, %arg8: memref<2x8x1xf32, #tpu.memory_space<vmem>>, %arg9: memref<1x2x32xf32, #tpu.memory_space<vmem>>, %arg10: memref<1x2x32xf32, #tpu.memory_space<vmem>>, %arg11: memref<8x2x128xf32, #tpu.memory_space<vmem>>, %arg12: memref<8x2x32xf32, #tpu.memory_space<vmem>>) attributes {dimension_semantics = [], scalar_prefetch = 0 : i64, scratch_operands = 2 : i64, tpu.core_type = #tpu.core_type<tc>} {
    %c0 = arith.constant 0 : index
    %c0_0 = arith.constant 0 : index
    %c0_1 = arith.constant 0 : index
    %0 = vector.load %arg0[%c0, %c0_0, %c0_1] : memref<2x8x8xf32, #tpu.memory_space<vmem>>, vector<2x8x8xf32>
    %1 = vector.shape_cast %0 : vector<2x8x8xf32> to vector<16x8xf32>
    %c0_2 = arith.constant 0 : index
    %c0_3 = arith.constant 0 : index
    %2 = vector.load %arg1[%c0_2, %c0_3] : memref<8x128xf32, #tpu.memory_space<vmem>>, vector<8x128xf32>
    %cst = arith.constant dense<0.000000e+00> : vector<16x128xf32>
    %3 = tpu.matmul %1, %2, %cst {dimension_numbers = #tpu.dot_dimension_numbers<[1], [0], [0], [1], [0, 0, 1, 1], [], []>} : vector<16x8xf32>, vector<8x128xf32>, vector<16x128xf32> -> vector<16x128xf32>
    %c0_4 = arith.constant 0 : index
    %c0_5 = arith.constant 0 : index
    %4 = vector.load %arg3[%c0_4, %c0_5] : memref<1x128xf32, #tpu.memory_space<vmem>>, vector<1x128xf32>
    %5 = vector.broadcast %4 : vector<1x128xf32> to vector<16x128xf32>
    %6 = arith.addf %3, %5 : vector<16x128xf32>
    %7 = vector.extract_strided_slice %6 {offsets = [0, 0], sizes = [1, 128], strides = [1, 1]} : vector<16x128xf32> to vector<1x128xf32>
    %8 = vector.extract_strided_slice %6 {offsets = [8, 0], sizes = [1, 128], strides = [1, 1]} : vector<16x128xf32> to vector<1x128xf32>
    %9 = tpu.concatenate %7, %8 in 0 : vector<1x128xf32>, vector<1x128xf32> -> vector<2x128xf32>
    %c0_6 = arith.constant 0 : index
    %c0_7 = arith.constant 0 : index
    %c0_8 = arith.constant 0 : index
    %10 = vector.load %arg11[%c0_6, %c0_7, %c0_8] : memref<8x2x128xf32, #tpu.memory_space<vmem>>, vector<1x2x128xf32>
    %11 = vector.shape_cast %10 : vector<1x2x128xf32> to vector<2x128xf32>
    %12 = vector.shape_cast %9 : vector<2x128xf32> to vector<1x2x128xf32>
    tpu.vector_store %arg11[%c0_6, %c0_7, %c0_8], %12 {strides = array<i32>} : memref<8x2x128xf32, #tpu.memory_space<vmem>>, vector<1x2x128xf32>,
    %13 = vector.extract_strided_slice %6 {offsets = [1, 0], sizes = [1, 128], strides = [1, 1]} : vector<16x128xf32> to vector<1x128xf32>
    %14 = vector.extract_strided_slice %6 {offsets = [9, 0], sizes = [1, 128], strides = [1, 1]} : vector<16x128xf32> to vector<1x128xf32>
    %15 = tpu.concatenate %13, %14 in 0 : vector<1x128xf32>, vector<1x128xf32> -> vector<2x128xf32>
    %c1 = arith.constant 1 : index
    %c0_9 = arith.constant 0 : index
    %c0_10 = arith.constant 0 : index
    %16 = vector.load %arg11[%c1, %c0_9, %c0_10] : memref<8x2x128xf32, #tpu.memory_space<vmem>>, vector<1x2x128xf32>
    %17 = vector.shape_cast %16 : vector<1x2x128xf32> to vector<2x128xf32>
    %18 = vector.shape_cast %15 : vector<2x128xf32> to vector<1x2x128xf32>
    tpu.vector_store %arg11[%c1, %c0_9, %c0_10], %18 {strides = array<i32>} : memref<8x2x128xf32, #tpu.memory_space<vmem>>, vector<1x2x128xf32>,
    %19 = vector.extract_strided_slice %6 {offsets = [2, 0], sizes = [1, 128], strides = [1, 1]} : vector<16x128xf32> to vector<1x128xf32>
    %20 = vector.extract_strided_slice %6 {offsets = [10, 0], sizes = [1, 128], strides = [1, 1]} : vector<16x128xf32> to vector<1x128xf32>
    %21 = tpu.concatenate %19, %20 in 0 : vector<1x128xf32>, vector<1x128xf32> -> vector<2x128xf32>
    %c2 = arith.constant 2 : index
    %c0_11 = arith.constant 0 : index
    %c0_12 = arith.constant 0 : index
    %22 = vector.load %arg11[%c2, %c0_11, %c0_12] : memref<8x2x128xf32, #tpu.memory_space<vmem>>, vector<1x2x128xf32>
    %23 = vector.shape_cast %22 : vector<1x2x128xf32> to vector<2x128xf32>
    %24 = vector.shape_cast %21 : vector<2x128xf32> to vector<1x2x128xf32>
    tpu.vector_store %arg11[%c2, %c0_11, %c0_12], %24 {strides = array<i32>} : memref<8x2x128xf32, #tpu.memory_space<vmem>>, vector<1x2x128xf32>,
    %25 = vector.extract_strided_slice %6 {offsets = [3, 0], sizes = [1, 128], strides = [1, 1]} : vector<16x128xf32> to vector<1x128xf32>
    %26 = vector.extract_strided_slice %6 {offsets = [11, 0], sizes = [1, 128], strides = [1, 1]} : vector<16x128xf32> to vector<1x128xf32>
    %27 = tpu.concatenate %25, %26 in 0 : vector<1x128xf32>, vector<1x128xf32> -> vector<2x128xf32>
    %c3 = arith.constant 3 : index
    %c0_13 = arith.constant 0 : index
    %c0_14 = arith.constant 0 : index
    %28 = vector.load %arg11[%c3, %c0_13, %c0_14] : memref<8x2x128xf32, #tpu.memory_space<vmem>>, vector<1x2x128xf32>
    %29 = vector.shape_cast %28 : vector<1x2x128xf32> to vector<2x128xf32>
    %30 = vector.shape_cast %27 : vector<2x128xf32> to vector<1x2x128xf32>
    tpu.vector_store %arg11[%c3, %c0_13, %c0_14], %30 {strides = array<i32>} : memref<8x2x128xf32, #tpu.memory_space<vmem>>, vector<1x2x128xf32>,
    %31 = vector.extract_strided_slice %6 {offsets = [4, 0], sizes = [1, 128], strides = [1, 1]} : vector<16x128xf32> to vector<1x128xf32>
    %32 = vector.extract_strided_slice %6 {offsets = [12, 0], sizes = [1, 128], strides = [1, 1]} : vector<16x128xf32> to vector<1x128xf32>
    %33 = tpu.concatenate %31, %32 in 0 : vector<1x128xf32>, vector<1x128xf32> -> vector<2x128xf32>
    %c4 = arith.constant 4 : index
    %c0_15 = arith.constant 0 : index
    %c0_16 = arith.constant 0 : index
    %34 = vector.load %arg11[%c4, %c0_15, %c0_16] : memref<8x2x128xf32, #tpu.memory_space<vmem>>, vector<1x2x128xf32>
    %35 = vector.shape_cast %34 : vector<1x2x128xf32> to vector<2x128xf32>
    %36 = vector.shape_cast %33 : vector<2x128xf32> to vector<1x2x128xf32>
    tpu.vector_store %arg11[%c4, %c0_15, %c0_16], %36 {strides = array<i32>} : memref<8x2x128xf32, #tpu.memory_space<vmem>>, vector<1x2x128xf32>,
    %37 = vector.extract_strided_slice %6 {offsets = [5, 0], sizes = [1, 128], strides = [1, 1]} : vector<16x128xf32> to vector<1x128xf32>
    %38 = vector.extract_strided_slice %6 {offsets = [13, 0], sizes = [1, 128], strides = [1, 1]} : vector<16x128xf32> to vector<1x128xf32>
    %39 = tpu.concatenate %37, %38 in 0 : vector<1x128xf32>, vector<1x128xf32> -> vector<2x128xf32>
    %c5 = arith.constant 5 : index
    %c0_17 = arith.constant 0 : index
    %c0_18 = arith.constant 0 : index
    %40 = vector.load %arg11[%c5, %c0_17, %c0_18] : memref<8x2x128xf32, #tpu.memory_space<vmem>>, vector<1x2x128xf32>
    %41 = vector.shape_cast %40 : vector<1x2x128xf32> to vector<2x128xf32>
    %42 = vector.shape_cast %39 : vector<2x128xf32> to vector<1x2x128xf32>
    tpu.vector_store %arg11[%c5, %c0_17, %c0_18], %42 {strides = array<i32>} : memref<8x2x128xf32, #tpu.memory_space<vmem>>, vector<1x2x128xf32>,
    %43 = vector.extract_strided_slice %6 {offsets = [6, 0], sizes = [1, 128], strides = [1, 1]} : vector<16x128xf32> to vector<1x128xf32>
    %44 = vector.extract_strided_slice %6 {offsets = [14, 0], sizes = [1, 128], strides = [1, 1]} : vector<16x128xf32> to vector<1x128xf32>
    %45 = tpu.concatenate %43, %44 in 0 : vector<1x128xf32>, vector<1x128xf32> -> vector<2x128xf32>
    %c6 = arith.constant 6 : index
    %c0_19 = arith.constant 0 : index
    %c0_20 = arith.constant 0 : index
    %46 = vector.load %arg11[%c6, %c0_19, %c0_20] : memref<8x2x128xf32, #tpu.memory_space<vmem>>, vector<1x2x128xf32>
    %47 = vector.shape_cast %46 : vector<1x2x128xf32> to vector<2x128xf32>
    %48 = vector.shape_cast %45 : vector<2x128xf32> to vector<1x2x128xf32>
    tpu.vector_store %arg11[%c6, %c0_19, %c0_20], %48 {strides = array<i32>} : memref<8x2x128xf32, #tpu.memory_space<vmem>>, vector<1x2x128xf32>,
    %49 = vector.extract_strided_slice %6 {offsets = [7, 0], sizes = [1, 128], strides = [1, 1]} : vector<16x128xf32> to vector<1x128xf32>
    %50 = vector.extract_strided_slice %6 {offsets = [15, 0], sizes = [1, 128], strides = [1, 1]} : vector<16x128xf32> to vector<1x128xf32>
    %51 = tpu.concatenate %49, %50 in 0 : vector<1x128xf32>, vector<1x128xf32> -> vector<2x128xf32>
    %c7 = arith.constant 7 : index
    %c0_21 = arith.constant 0 : index
    %c0_22 = arith.constant 0 : index
    %52 = vector.load %arg11[%c7, %c0_21, %c0_22] : memref<8x2x128xf32, #tpu.memory_space<vmem>>, vector<1x2x128xf32>
    %53 = vector.shape_cast %52 : vector<1x2x128xf32> to vector<2x128xf32>
    %54 = vector.shape_cast %51 : vector<2x128xf32> to vector<1x2x128xf32>
    tpu.vector_store %arg11[%c7, %c0_21, %c0_22], %54 {strides = array<i32>} : memref<8x2x128xf32, #tpu.memory_space<vmem>>, vector<1x2x128xf32>,
    %c0_23 = arith.constant 0 : index
    %c0_24 = arith.constant 0 : index
    %55 = vector.load %arg2[%c0_23, %c0_24] : memref<32x128xf32, #tpu.memory_space<vmem>>, vector<32x128xf32>
    %c0_25 = arith.constant 0 : index
    %c0_26 = arith.constant 0 : index
    %56 = vector.load %arg6[%c0_25, %c0_26] : memref<2x32xf32, #tpu.memory_space<vmem>>, vector<2x32xf32>
    %c0_27 = arith.constant 0 : index
    %c0_28 = arith.constant 0 : index
    %57 = vector.load %arg7[%c0_27, %c0_28] : memref<2x32xf32, #tpu.memory_space<vmem>>, vector<2x32xf32>
    %c0_i32 = arith.constant 0 : i32
    %58 = arith.index_cast %c0_i32 : i32 to index
    %c0_29 = arith.constant 0 : index
    %c0_30 = arith.constant 0 : index
    %59 = vector.load %arg11[%58, %c0_29, %c0_30] : memref<8x2x128xf32, #tpu.memory_space<vmem>>, vector<1x2x128xf32>
    %60 = vector.shape_cast %59 : vector<1x2x128xf32> to vector<2x128xf32>
    %cst_31 = arith.constant dense<0.000000e+00> : vector<2x128xf32>
    %61 = tpu.matmul %56, %55, %cst_31 {dimension_numbers = #tpu.dot_dimension_numbers<[1], [0], [0], [1], [0, 0, 1, 1], [], []>} : vector<2x32xf32>, vector<32x128xf32>, vector<2x128xf32> -> vector<2x128xf32>
    %62 = arith.addf %60, %61 : vector<2x128xf32>
    %63 = arith.negf %62 : vector<2x128xf32>
    %64 = math.exp %63 : vector<2x128xf32>
    %cst_32 = arith.constant 1.000000e+00 : f32
    %65 = vector.broadcast %cst_32 : f32 to vector<2x128xf32>
    %66 = arith.addf %65, %64 : vector<2x128xf32>
    %67 = arith.divf %65, %66 : vector<2x128xf32>
    %68 = vector.extract_strided_slice %67 {offsets = [0, 0], sizes = [2, 32], strides = [1, 1]} : vector<2x128xf32> to vector<2x32xf32>
    %69 = vector.extract_strided_slice %67 {offsets = [0, 32], sizes = [2, 32], strides = [1, 1]} : vector<2x128xf32> to vector<2x32xf32>
    %70 = vector.extract_strided_slice %67 {offsets = [0, 64], sizes = [2, 32], strides = [1, 1]} : vector<2x128xf32> to vector<2x32xf32>
    %cst_33 = arith.constant 2.000000e+00 : f32
    %71 = vector.broadcast %cst_33 : f32 to vector<2x32xf32>
    %72 = arith.mulf %71, %70 : vector<2x32xf32>
    %cst_34 = arith.constant 1.000000e+00 : f32
    %73 = vector.broadcast %cst_34 : f32 to vector<2x32xf32>
    %74 = arith.subf %72, %73 : vector<2x32xf32>
    %75 = vector.extract_strided_slice %67 {offsets = [0, 96], sizes = [2, 32], strides = [1, 1]} : vector<2x128xf32> to vector<2x32xf32>
    %76 = arith.mulf %69, %57 : vector<2x32xf32>
    %77 = arith.mulf %68, %74 : vector<2x32xf32>
    %78 = arith.addf %76, %77 : vector<2x32xf32>
    %79 = math.tanh %78 : vector<2x32xf32>
    %80 = arith.mulf %75, %79 : vector<2x32xf32>
    %81 = arith.index_cast %c0_i32 : i32 to index
    %c0_35 = arith.constant 0 : index
    %c0_36 = arith.constant 0 : index
    %82 = vector.load %arg12[%81, %c0_35, %c0_36] : memref<8x2x32xf32, #tpu.memory_space<vmem>>, vector<1x2x32xf32>
    %83 = vector.shape_cast %82 : vector<1x2x32xf32> to vector<2x32xf32>
    %84 = vector.shape_cast %80 : vector<2x32xf32> to vector<1x2x32xf32>
    tpu.vector_store %arg12[%81, %c0_35, %c0_36], %84 {strides = array<i32>} : memref<8x2x32xf32, #tpu.memory_space<vmem>>, vector<1x2x32xf32>,
    %c1_i32 = arith.constant 1 : i32
    %85 = arith.index_cast %c1_i32 : i32 to index
    %c0_37 = arith.constant 0 : index
    %c0_38 = arith.constant 0 : index
    %86 = vector.load %arg11[%85, %c0_37, %c0_38] : memref<8x2x128xf32, #tpu.memory_space<vmem>>, vector<1x2x128xf32>
    %87 = vector.shape_cast %86 : vector<1x2x128xf32> to vector<2x128xf32>
    %cst_39 = arith.constant dense<0.000000e+00> : vector<2x128xf32>
    %88 = tpu.matmul %80, %55, %cst_39 {dimension_numbers = #tpu.dot_dimension_numbers<[1], [0], [0], [1], [0, 0, 1, 1], [], []>} : vector<2x32xf32>, vector<32x128xf32>, vector<2x128xf32> -> vector<2x128xf32>
    %89 = arith.addf %87, %88 : vector<2x128xf32>
    %90 = arith.negf %89 : vector<2x128xf32>
    %91 = math.exp %90 : vector<2x128xf32>
    %cst_40 = arith.constant 1.000000e+00 : f32
    %92 = vector.broadcast %cst_40 : f32 to vector<2x128xf32>
    %93 = arith.addf %92, %91 : vector<2x128xf32>
    %94 = arith.divf %92, %93 : vector<2x128xf32>
    %95 = vector.extract_strided_slice %94 {offsets = [0, 0], sizes = [2, 32], strides = [1, 1]} : vector<2x128xf32> to vector<2x32xf32>
    %96 = vector.extract_strided_slice %94 {offsets = [0, 32], sizes = [2, 32], strides = [1, 1]} : vector<2x128xf32> to vector<2x32xf32>
    %97 = vector.extract_strided_slice %94 {offsets = [0, 64], sizes = [2, 32], strides = [1, 1]} : vector<2x128xf32> to vector<2x32xf32>
    %cst_41 = arith.constant 2.000000e+00 : f32
    %98 = vector.broadcast %cst_41 : f32 to vector<2x32xf32>
    %99 = arith.mulf %98, %97 : vector<2x32xf32>
    %cst_42 = arith.constant 1.000000e+00 : f32
    %100 = vector.broadcast %cst_42 : f32 to vector<2x32xf32>
    %101 = arith.subf %99, %100 : vector<2x32xf32>
    %102 = vector.extract_strided_slice %94 {offsets = [0, 96], sizes = [2, 32], strides = [1, 1]} : vector<2x128xf32> to vector<2x32xf32>
    %103 = arith.mulf %96, %78 : vector<2x32xf32>
    %104 = arith.mulf %95, %101 : vector<2x32xf32>
    %105 = arith.addf %103, %104 : vector<2x32xf32>
    %106 = math.tanh %105 : vector<2x32xf32>
    %107 = arith.mulf %102, %106 : vector<2x32xf32>
    %108 = arith.index_cast %c1_i32 : i32 to index
    %c0_43 = arith.constant 0 : index
    %c0_44 = arith.constant 0 : index
    %109 = vector.load %arg12[%108, %c0_43, %c0_44] : memref<8x2x32xf32, #tpu.memory_space<vmem>>, vector<1x2x32xf32>
    %110 = vector.shape_cast %109 : vector<1x2x32xf32> to vector<2x32xf32>
    %111 = vector.shape_cast %107 : vector<2x32xf32> to vector<1x2x32xf32>
    tpu.vector_store %arg12[%108, %c0_43, %c0_44], %111 {strides = array<i32>} : memref<8x2x32xf32, #tpu.memory_space<vmem>>, vector<1x2x32xf32>,
    %c2_i32 = arith.constant 2 : i32
    %112 = arith.index_cast %c2_i32 : i32 to index
    %c0_45 = arith.constant 0 : index
    %c0_46 = arith.constant 0 : index
    %113 = vector.load %arg11[%112, %c0_45, %c0_46] : memref<8x2x128xf32, #tpu.memory_space<vmem>>, vector<1x2x128xf32>
    %114 = vector.shape_cast %113 : vector<1x2x128xf32> to vector<2x128xf32>
    %cst_47 = arith.constant dense<0.000000e+00> : vector<2x128xf32>
    %115 = tpu.matmul %107, %55, %cst_47 {dimension_numbers = #tpu.dot_dimension_numbers<[1], [0], [0], [1], [0, 0, 1, 1], [], []>} : vector<2x32xf32>, vector<32x128xf32>, vector<2x128xf32> -> vector<2x128xf32>
    %116 = arith.addf %114, %115 : vector<2x128xf32>
    %117 = arith.negf %116 : vector<2x128xf32>
    %118 = math.exp %117 : vector<2x128xf32>
    %cst_48 = arith.constant 1.000000e+00 : f32
    %119 = vector.broadcast %cst_48 : f32 to vector<2x128xf32>
    %120 = arith.addf %119, %118 : vector<2x128xf32>
    %121 = arith.divf %119, %120 : vector<2x128xf32>
    %122 = vector.extract_strided_slice %121 {offsets = [0, 0], sizes = [2, 32], strides = [1, 1]} : vector<2x128xf32> to vector<2x32xf32>
    %123 = vector.extract_strided_slice %121 {offsets = [0, 32], sizes = [2, 32], strides = [1, 1]} : vector<2x128xf32> to vector<2x32xf32>
    %124 = vector.extract_strided_slice %121 {offsets = [0, 64], sizes = [2, 32], strides = [1, 1]} : vector<2x128xf32> to vector<2x32xf32>
    %cst_49 = arith.constant 2.000000e+00 : f32
    %125 = vector.broadcast %cst_49 : f32 to vector<2x32xf32>
    %126 = arith.mulf %125, %124 : vector<2x32xf32>
    %cst_50 = arith.constant 1.000000e+00 : f32
    %127 = vector.broadcast %cst_50 : f32 to vector<2x32xf32>
    %128 = arith.subf %126, %127 : vector<2x32xf32>
    %129 = vector.extract_strided_slice %121 {offsets = [0, 96], sizes = [2, 32], strides = [1, 1]} : vector<2x128xf32> to vector<2x32xf32>
    %130 = arith.mulf %123, %105 : vector<2x32xf32>
    %131 = arith.mulf %122, %128 : vector<2x32xf32>
    %132 = arith.addf %130, %131 : vector<2x32xf32>
    %133 = math.tanh %132 : vector<2x32xf32>
    %134 = arith.mulf %129, %133 : vector<2x32xf32>
    %135 = arith.index_cast %c2_i32 : i32 to index
    %c0_51 = arith.constant 0 : index
    %c0_52 = arith.constant 0 : index
    %136 = vector.load %arg12[%135, %c0_51, %c0_52] : memref<8x2x32xf32, #tpu.memory_space<vmem>>, vector<1x2x32xf32>
    %137 = vector.shape_cast %136 : vector<1x2x32xf32> to vector<2x32xf32>
    %138 = vector.shape_cast %134 : vector<2x32xf32> to vector<1x2x32xf32>
    tpu.vector_store %arg12[%135, %c0_51, %c0_52], %138 {strides = array<i32>} : memref<8x2x32xf32, #tpu.memory_space<vmem>>, vector<1x2x32xf32>,
    %c3_i32 = arith.constant 3 : i32
    %139 = arith.index_cast %c3_i32 : i32 to index
    %c0_53 = arith.constant 0 : index
    %c0_54 = arith.constant 0 : index
    %140 = vector.load %arg11[%139, %c0_53, %c0_54] : memref<8x2x128xf32, #tpu.memory_space<vmem>>, vector<1x2x128xf32>
    %141 = vector.shape_cast %140 : vector<1x2x128xf32> to vector<2x128xf32>
    %cst_55 = arith.constant dense<0.000000e+00> : vector<2x128xf32>
    %142 = tpu.matmul %134, %55, %cst_55 {dimension_numbers = #tpu.dot_dimension_numbers<[1], [0], [0], [1], [0, 0, 1, 1], [], []>} : vector<2x32xf32>, vector<32x128xf32>, vector<2x128xf32> -> vector<2x128xf32>
    %143 = arith.addf %141, %142 : vector<2x128xf32>
    %144 = arith.negf %143 : vector<2x128xf32>
    %145 = math.exp %144 : vector<2x128xf32>
    %cst_56 = arith.constant 1.000000e+00 : f32
    %146 = vector.broadcast %cst_56 : f32 to vector<2x128xf32>
    %147 = arith.addf %146, %145 : vector<2x128xf32>
    %148 = arith.divf %146, %147 : vector<2x128xf32>
    %149 = vector.extract_strided_slice %148 {offsets = [0, 0], sizes = [2, 32], strides = [1, 1]} : vector<2x128xf32> to vector<2x32xf32>
    %150 = vector.extract_strided_slice %148 {offsets = [0, 32], sizes = [2, 32], strides = [1, 1]} : vector<2x128xf32> to vector<2x32xf32>
    %151 = vector.extract_strided_slice %148 {offsets = [0, 64], sizes = [2, 32], strides = [1, 1]} : vector<2x128xf32> to vector<2x32xf32>
    %cst_57 = arith.constant 2.000000e+00 : f32
    %152 = vector.broadcast %cst_57 : f32 to vector<2x32xf32>
    %153 = arith.mulf %152, %151 : vector<2x32xf32>
    %cst_58 = arith.constant 1.000000e+00 : f32
    %154 = vector.broadcast %cst_58 : f32 to vector<2x32xf32>
    %155 = arith.subf %153, %154 : vector<2x32xf32>
    %156 = vector.extract_strided_slice %148 {offsets = [0, 96], sizes = [2, 32], strides = [1, 1]} : vector<2x128xf32> to vector<2x32xf32>
    %157 = arith.mulf %150, %132 : vector<2x32xf32>
    %158 = arith.mulf %149, %155 : vector<2x32xf32>
    %159 = arith.addf %157, %158 : vector<2x32xf32>
    %160 = math.tanh %159 : vector<2x32xf32>
    %161 = arith.mulf %156, %160 : vector<2x32xf32>
    %162 = arith.index_cast %c3_i32 : i32 to index
    %c0_59 = arith.constant 0 : index
    %c0_60 = arith.constant 0 : index
    %163 = vector.load %arg12[%162, %c0_59, %c0_60] : memref<8x2x32xf32, #tpu.memory_space<vmem>>, vector<1x2x32xf32>
    %164 = vector.shape_cast %163 : vector<1x2x32xf32> to vector<2x32xf32>
    %165 = vector.shape_cast %161 : vector<2x32xf32> to vector<1x2x32xf32>
    tpu.vector_store %arg12[%162, %c0_59, %c0_60], %165 {strides = array<i32>} : memref<8x2x32xf32, #tpu.memory_space<vmem>>, vector<1x2x32xf32>,
    %c4_i32 = arith.constant 4 : i32
    %166 = arith.index_cast %c4_i32 : i32 to index
    %c0_61 = arith.constant 0 : index
    %c0_62 = arith.constant 0 : index
    %167 = vector.load %arg11[%166, %c0_61, %c0_62] : memref<8x2x128xf32, #tpu.memory_space<vmem>>, vector<1x2x128xf32>
    %168 = vector.shape_cast %167 : vector<1x2x128xf32> to vector<2x128xf32>
    %cst_63 = arith.constant dense<0.000000e+00> : vector<2x128xf32>
    %169 = tpu.matmul %161, %55, %cst_63 {dimension_numbers = #tpu.dot_dimension_numbers<[1], [0], [0], [1], [0, 0, 1, 1], [], []>} : vector<2x32xf32>, vector<32x128xf32>, vector<2x128xf32> -> vector<2x128xf32>
    %170 = arith.addf %168, %169 : vector<2x128xf32>
    %171 = arith.negf %170 : vector<2x128xf32>
    %172 = math.exp %171 : vector<2x128xf32>
    %cst_64 = arith.constant 1.000000e+00 : f32
    %173 = vector.broadcast %cst_64 : f32 to vector<2x128xf32>
    %174 = arith.addf %173, %172 : vector<2x128xf32>
    %175 = arith.divf %173, %174 : vector<2x128xf32>
    %176 = vector.extract_strided_slice %175 {offsets = [0, 0], sizes = [2, 32], strides = [1, 1]} : vector<2x128xf32> to vector<2x32xf32>
    %177 = vector.extract_strided_slice %175 {offsets = [0, 32], sizes = [2, 32], strides = [1, 1]} : vector<2x128xf32> to vector<2x32xf32>
    %178 = vector.extract_strided_slice %175 {offsets = [0, 64], sizes = [2, 32], strides = [1, 1]} : vector<2x128xf32> to vector<2x32xf32>
    %cst_65 = arith.constant 2.000000e+00 : f32
    %179 = vector.broadcast %cst_65 : f32 to vector<2x32xf32>
    %180 = arith.mulf %179, %178 : vector<2x32xf32>
    %cst_66 = arith.constant 1.000000e+00 : f32
    %181 = vector.broadcast %cst_66 : f32 to vector<2x32xf32>
    %182 = arith.subf %180, %181 : vector<2x32xf32>
    %183 = vector.extract_strided_slice %175 {offsets = [0, 96], sizes = [2, 32], strides = [1, 1]} : vector<2x128xf32> to vector<2x32xf32>
    %184 = arith.mulf %177, %159 : vector<2x32xf32>
    %185 = arith.mulf %176, %182 : vector<2x32xf32>
    %186 = arith.addf %184, %185 : vector<2x32xf32>
    %187 = math.tanh %186 : vector<2x32xf32>
    %188 = arith.mulf %183, %187 : vector<2x32xf32>
    %189 = arith.index_cast %c4_i32 : i32 to index
    %c0_67 = arith.constant 0 : index
    %c0_68 = arith.constant 0 : index
    %190 = vector.load %arg12[%189, %c0_67, %c0_68] : memref<8x2x32xf32, #tpu.memory_space<vmem>>, vector<1x2x32xf32>
    %191 = vector.shape_cast %190 : vector<1x2x32xf32> to vector<2x32xf32>
    %192 = vector.shape_cast %188 : vector<2x32xf32> to vector<1x2x32xf32>
    tpu.vector_store %arg12[%189, %c0_67, %c0_68], %192 {strides = array<i32>} : memref<8x2x32xf32, #tpu.memory_space<vmem>>, vector<1x2x32xf32>,
    %c5_i32 = arith.constant 5 : i32
    %193 = arith.index_cast %c5_i32 : i32 to index
    %c0_69 = arith.constant 0 : index
    %c0_70 = arith.constant 0 : index
    %194 = vector.load %arg11[%193, %c0_69, %c0_70] : memref<8x2x128xf32, #tpu.memory_space<vmem>>, vector<1x2x128xf32>
    %195 = vector.shape_cast %194 : vector<1x2x128xf32> to vector<2x128xf32>
    %cst_71 = arith.constant dense<0.000000e+00> : vector<2x128xf32>
    %196 = tpu.matmul %188, %55, %cst_71 {dimension_numbers = #tpu.dot_dimension_numbers<[1], [0], [0], [1], [0, 0, 1, 1], [], []>} : vector<2x32xf32>, vector<32x128xf32>, vector<2x128xf32> -> vector<2x128xf32>
    %197 = arith.addf %195, %196 : vector<2x128xf32>
    %198 = arith.negf %197 : vector<2x128xf32>
    %199 = math.exp %198 : vector<2x128xf32>
    %cst_72 = arith.constant 1.000000e+00 : f32
    %200 = vector.broadcast %cst_72 : f32 to vector<2x128xf32>
    %201 = arith.addf %200, %199 : vector<2x128xf32>
    %202 = arith.divf %200, %201 : vector<2x128xf32>
    %203 = vector.extract_strided_slice %202 {offsets = [0, 0], sizes = [2, 32], strides = [1, 1]} : vector<2x128xf32> to vector<2x32xf32>
    %204 = vector.extract_strided_slice %202 {offsets = [0, 32], sizes = [2, 32], strides = [1, 1]} : vector<2x128xf32> to vector<2x32xf32>
    %205 = vector.extract_strided_slice %202 {offsets = [0, 64], sizes = [2, 32], strides = [1, 1]} : vector<2x128xf32> to vector<2x32xf32>
    %cst_73 = arith.constant 2.000000e+00 : f32
    %206 = vector.broadcast %cst_73 : f32 to vector<2x32xf32>
    %207 = arith.mulf %206, %205 : vector<2x32xf32>
    %cst_74 = arith.constant 1.000000e+00 : f32
    %208 = vector.broadcast %cst_74 : f32 to vector<2x32xf32>
    %209 = arith.subf %207, %208 : vector<2x32xf32>
    %210 = vector.extract_strided_slice %202 {offsets = [0, 96], sizes = [2, 32], strides = [1, 1]} : vector<2x128xf32> to vector<2x32xf32>
    %211 = arith.mulf %204, %186 : vector<2x32xf32>
    %212 = arith.mulf %203, %209 : vector<2x32xf32>
    %213 = arith.addf %211, %212 : vector<2x32xf32>
    %214 = math.tanh %213 : vector<2x32xf32>
    %215 = arith.mulf %210, %214 : vector<2x32xf32>
    %216 = arith.index_cast %c5_i32 : i32 to index
    %c0_75 = arith.constant 0 : index
    %c0_76 = arith.constant 0 : index
    %217 = vector.load %arg12[%216, %c0_75, %c0_76] : memref<8x2x32xf32, #tpu.memory_space<vmem>>, vector<1x2x32xf32>
    %218 = vector.shape_cast %217 : vector<1x2x32xf32> to vector<2x32xf32>
    %219 = vector.shape_cast %215 : vector<2x32xf32> to vector<1x2x32xf32>
    tpu.vector_store %arg12[%216, %c0_75, %c0_76], %219 {strides = array<i32>} : memref<8x2x32xf32, #tpu.memory_space<vmem>>, vector<1x2x32xf32>,
    %c6_i32 = arith.constant 6 : i32
    %220 = arith.index_cast %c6_i32 : i32 to index
    %c0_77 = arith.constant 0 : index
    %c0_78 = arith.constant 0 : index
    %221 = vector.load %arg11[%220, %c0_77, %c0_78] : memref<8x2x128xf32, #tpu.memory_space<vmem>>, vector<1x2x128xf32>
    %222 = vector.shape_cast %221 : vector<1x2x128xf32> to vector<2x128xf32>
    %cst_79 = arith.constant dense<0.000000e+00> : vector<2x128xf32>
    %223 = tpu.matmul %215, %55, %cst_79 {dimension_numbers = #tpu.dot_dimension_numbers<[1], [0], [0], [1], [0, 0, 1, 1], [], []>} : vector<2x32xf32>, vector<32x128xf32>, vector<2x128xf32> -> vector<2x128xf32>
    %224 = arith.addf %222, %223 : vector<2x128xf32>
    %225 = arith.negf %224 : vector<2x128xf32>
    %226 = math.exp %225 : vector<2x128xf32>
    %cst_80 = arith.constant 1.000000e+00 : f32
    %227 = vector.broadcast %cst_80 : f32 to vector<2x128xf32>
    %228 = arith.addf %227, %226 : vector<2x128xf32>
    %229 = arith.divf %227, %228 : vector<2x128xf32>
    %230 = vector.extract_strided_slice %229 {offsets = [0, 0], sizes = [2, 32], strides = [1, 1]} : vector<2x128xf32> to vector<2x32xf32>
    %231 = vector.extract_strided_slice %229 {offsets = [0, 32], sizes = [2, 32], strides = [1, 1]} : vector<2x128xf32> to vector<2x32xf32>
    %232 = vector.extract_strided_slice %229 {offsets = [0, 64], sizes = [2, 32], strides = [1, 1]} : vector<2x128xf32> to vector<2x32xf32>
    %cst_81 = arith.constant 2.000000e+00 : f32
    %233 = vector.broadcast %cst_81 : f32 to vector<2x32xf32>
    %234 = arith.mulf %233, %232 : vector<2x32xf32>
    %cst_82 = arith.constant 1.000000e+00 : f32
    %235 = vector.broadcast %cst_82 : f32 to vector<2x32xf32>
    %236 = arith.subf %234, %235 : vector<2x32xf32>
    %237 = vector.extract_strided_slice %229 {offsets = [0, 96], sizes = [2, 32], strides = [1, 1]} : vector<2x128xf32> to vector<2x32xf32>
    %238 = arith.mulf %231, %213 : vector<2x32xf32>
    %239 = arith.mulf %230, %236 : vector<2x32xf32>
    %240 = arith.addf %238, %239 : vector<2x32xf32>
    %241 = math.tanh %240 : vector<2x32xf32>
    %242 = arith.mulf %237, %241 : vector<2x32xf32>
    %243 = arith.index_cast %c6_i32 : i32 to index
    %c0_83 = arith.constant 0 : index
    %c0_84 = arith.constant 0 : index
    %244 = vector.load %arg12[%243, %c0_83, %c0_84] : memref<8x2x32xf32, #tpu.memory_space<vmem>>, vector<1x2x32xf32>
    %245 = vector.shape_cast %244 : vector<1x2x32xf32> to vector<2x32xf32>
    %246 = vector.shape_cast %242 : vector<2x32xf32> to vector<1x2x32xf32>
    tpu.vector_store %arg12[%243, %c0_83, %c0_84], %246 {strides = array<i32>} : memref<8x2x32xf32, #tpu.memory_space<vmem>>, vector<1x2x32xf32>,
    %c7_i32 = arith.constant 7 : i32
    %247 = arith.index_cast %c7_i32 : i32 to index
    %c0_85 = arith.constant 0 : index
    %c0_86 = arith.constant 0 : index
    %248 = vector.load %arg11[%247, %c0_85, %c0_86] : memref<8x2x128xf32, #tpu.memory_space<vmem>>, vector<1x2x128xf32>
    %249 = vector.shape_cast %248 : vector<1x2x128xf32> to vector<2x128xf32>
    %cst_87 = arith.constant dense<0.000000e+00> : vector<2x128xf32>
    %250 = tpu.matmul %242, %55, %cst_87 {dimension_numbers = #tpu.dot_dimension_numbers<[1], [0], [0], [1], [0, 0, 1, 1], [], []>} : vector<2x32xf32>, vector<32x128xf32>, vector<2x128xf32> -> vector<2x128xf32>
    %251 = arith.addf %249, %250 : vector<2x128xf32>
    %252 = arith.negf %251 : vector<2x128xf32>
    %253 = math.exp %252 : vector<2x128xf32>
    %cst_88 = arith.constant 1.000000e+00 : f32
    %254 = vector.broadcast %cst_88 : f32 to vector<2x128xf32>
    %255 = arith.addf %254, %253 : vector<2x128xf32>
    %256 = arith.divf %254, %255 : vector<2x128xf32>
    %257 = vector.extract_strided_slice %256 {offsets = [0, 0], sizes = [2, 32], strides = [1, 1]} : vector<2x128xf32> to vector<2x32xf32>
    %258 = vector.extract_strided_slice %256 {offsets = [0, 32], sizes = [2, 32], strides = [1, 1]} : vector<2x128xf32> to vector<2x32xf32>
    %259 = vector.extract_strided_slice %256 {offsets = [0, 64], sizes = [2, 32], strides = [1, 1]} : vector<2x128xf32> to vector<2x32xf32>
    %cst_89 = arith.constant 2.000000e+00 : f32
    %260 = vector.broadcast %cst_89 : f32 to vector<2x32xf32>
    %261 = arith.mulf %260, %259 : vector<2x32xf32>
    %cst_90 = arith.constant 1.000000e+00 : f32
    %262 = vector.broadcast %cst_90 : f32 to vector<2x32xf32>
    %263 = arith.subf %261, %262 : vector<2x32xf32>
    %264 = vector.extract_strided_slice %256 {offsets = [0, 96], sizes = [2, 32], strides = [1, 1]} : vector<2x128xf32> to vector<2x32xf32>
    %265 = arith.mulf %258, %240 : vector<2x32xf32>
    %266 = arith.mulf %257, %263 : vector<2x32xf32>
    %267 = arith.addf %265, %266 : vector<2x32xf32>
    %268 = math.tanh %267 : vector<2x32xf32>
    %269 = arith.mulf %264, %268 : vector<2x32xf32>
    %270 = arith.index_cast %c7_i32 : i32 to index
    %c0_91 = arith.constant 0 : index
    %c0_92 = arith.constant 0 : index
    %271 = vector.load %arg12[%270, %c0_91, %c0_92] : memref<8x2x32xf32, #tpu.memory_space<vmem>>, vector<1x2x32xf32>
    %272 = vector.shape_cast %271 : vector<1x2x32xf32> to vector<2x32xf32>
    %273 = vector.shape_cast %269 : vector<2x32xf32> to vector<1x2x32xf32>
    tpu.vector_store %arg12[%270, %c0_91, %c0_92], %273 {strides = array<i32>} : memref<8x2x32xf32, #tpu.memory_space<vmem>>, vector<1x2x32xf32>,
    %c8_i32 = arith.constant 8 : i32
    %c0_93 = arith.constant 0 : index
    %c0_94 = arith.constant 0 : index
    %c0_95 = arith.constant 0 : index
    %274 = vector.load %arg9[%c0_93, %c0_94, %c0_95] : memref<1x2x32xf32, #tpu.memory_space<vmem>>, vector<1x2x32xf32>
    %275 = vector.shape_cast %274 : vector<1x2x32xf32> to vector<2x32xf32>
    %276 = vector.shape_cast %269 : vector<2x32xf32> to vector<1x2x32xf32>
    tpu.vector_store %arg9[%c0_93, %c0_94, %c0_95], %276 {strides = array<i32>} : memref<1x2x32xf32, #tpu.memory_space<vmem>>, vector<1x2x32xf32>,
    %c0_96 = arith.constant 0 : index
    %c0_97 = arith.constant 0 : index
    %c0_98 = arith.constant 0 : index
    %277 = vector.load %arg10[%c0_96, %c0_97, %c0_98] : memref<1x2x32xf32, #tpu.memory_space<vmem>>, vector<1x2x32xf32>
    %278 = vector.shape_cast %277 : vector<1x2x32xf32> to vector<2x32xf32>
    %279 = vector.shape_cast %267 : vector<2x32xf32> to vector<1x2x32xf32>
    tpu.vector_store %arg10[%c0_96, %c0_97, %c0_98], %279 {strides = array<i32>} : memref<1x2x32xf32, #tpu.memory_space<vmem>>, vector<1x2x32xf32>,
    %c0_99 = arith.constant 0 : index
    %c0_100 = arith.constant 0 : index
    %c0_101 = arith.constant 0 : index
    %280 = vector.load %arg12[%c0_99, %c0_100, %c0_101] : memref<8x2x32xf32, #tpu.memory_space<vmem>>, vector<8x2x32xf32>
    %c0_102 = arith.constant 0 : index
    %c0_103 = arith.constant 0 : index
    %281 = vector.load %arg4[%c0_102, %c0_103] : memref<32x1xf32, #tpu.memory_space<vmem>>, vector<32x1xf32>
    %c0_104 = arith.constant 0 : index
    %c0_105 = arith.constant 0 : index
    %282 = vector.load %arg5[%c0_104, %c0_105] : memref<1x1xf32, #tpu.memory_space<vmem>>, vector<1x1xf32>
    %283 = vector.extract_strided_slice %280 {offsets = [0, 0, 0], sizes = [8, 1, 32], strides = [1, 1, 1]} : vector<8x2x32xf32> to vector<8x1x32xf32>
    %284 = vector.shape_cast %283 : vector<8x1x32xf32> to vector<8x32xf32>
    %cst_106 = arith.constant dense<0.000000e+00> : vector<8x1xf32>
    %285 = tpu.matmul %284, %281, %cst_106 {dimension_numbers = #tpu.dot_dimension_numbers<[1], [0], [0], [1], [0, 0, 1, 1], [], []>} : vector<8x32xf32>, vector<32x1xf32>, vector<8x1xf32> -> vector<8x1xf32>
    %286 = vector.broadcast %282 : vector<1x1xf32> to vector<8x1xf32>
    %287 = arith.addf %285, %286 : vector<8x1xf32>
    %c0_107 = arith.constant 0 : index
    %c0_108 = arith.constant 0 : index
    %c0_109 = arith.constant 0 : index
    %288 = vector.load %arg8[%c0_107, %c0_108, %c0_109] : memref<2x8x1xf32, #tpu.memory_space<vmem>>, vector<1x8x1xf32>
    %289 = vector.shape_cast %288 : vector<1x8x1xf32> to vector<8x1xf32>
    %290 = vector.shape_cast %287 : vector<8x1xf32> to vector<1x8x1xf32>
    tpu.vector_store %arg8[%c0_107, %c0_108, %c0_109], %290 {strides = array<i32>} : memref<2x8x1xf32, #tpu.memory_space<vmem>>, vector<1x8x1xf32>,
    %291 = vector.extract_strided_slice %280 {offsets = [0, 1, 0], sizes = [8, 1, 32], strides = [1, 1, 1]} : vector<8x2x32xf32> to vector<8x1x32xf32>
    %292 = vector.shape_cast %291 : vector<8x1x32xf32> to vector<8x32xf32>
    %cst_110 = arith.constant dense<0.000000e+00> : vector<8x1xf32>
    %293 = tpu.matmul %292, %281, %cst_110 {dimension_numbers = #tpu.dot_dimension_numbers<[1], [0], [0], [1], [0, 0, 1, 1], [], []>} : vector<8x32xf32>, vector<32x1xf32>, vector<8x1xf32> -> vector<8x1xf32>
    %294 = vector.broadcast %282 : vector<1x1xf32> to vector<8x1xf32>
    %295 = arith.addf %293, %294 : vector<8x1xf32>
    %c1_111 = arith.constant 1 : index
    %c0_112 = arith.constant 0 : index
    %c0_113 = arith.constant 0 : index
    %296 = vector.load %arg8[%c1_111, %c0_112, %c0_113] : memref<2x8x1xf32, #tpu.memory_space<vmem>>, vector<1x8x1xf32>
    %297 = vector.shape_cast %296 : vector<1x8x1xf32> to vector<8x1xf32>
    %298 = vector.shape_cast %295 : vector<8x1xf32> to vector<1x8x1xf32>
    tpu.vector_store %arg8[%c1_111, %c0_112, %c0_113], %298 {strides = array<i32>} : memref<2x8x1xf32, #tpu.memory_space<vmem>>, vector<1x8x1xf32>,
    return
  }
}

</mosaic_0001>

<bundles_post_ra>
// kernel: lstm_net_forward.1
= control target key start
LH: loop header
LB: loop body
LE: loop exit
PB: predicated region body
PF: predicated region fallthrough
CT: control target
= control target key end

     0   :  { %s1906_s0 = inlined_call_operand.vmem [shape: f32[2,8,8], index: 0, kind: input, shape index: {}]   ;;  %s1907_s1 = inlined_call_operand.vmem [shape: f32[8,128], index: 1, kind: input, shape index: {}]   ;;  %s1908_s2 = inlined_call_operand.vmem [shape: f32[32,128], index: 2, kind: input, shape index: {}]   ;;  %s1909_s3 = inlined_call_operand.vmem [shape: f32[1,128], index: 3, kind: input, shape index: {}]   ;;  %s1910_s4 = inlined_call_operand.vmem [shape: f32[32,1], index: 4, kind: input, shape index: {}]   ;;  %s1911_s5 = inlined_call_operand.<no memory space> [shape: f32[1,1], index: 5, kind: input, shape index: {}]   ;;  %s1912_s6 = inlined_call_operand.vmem [shape: f32[2,32], index: 6, kind: input, shape index: {}]   ;;  %s1913_s7 = inlined_call_operand.vmem [shape: f32[2,32], index: 7, kind: input, shape index: {}]   ;;  %s1914_s8 = inlined_call_operand.vmem [shape: f32[2,8,1], index: 8, kind: output, shape index: {0}]   ;;  %s1915_s9 = inlined_call_operand.hbm [shape: f32[1,2,32], index: 9, kind: output, shape index: {1}]   ;;  %s1916_s10 = inlined_call_operand.hbm [shape: f32[1,2,32], index: 10, kind: output, shape index: {2}]  }
   0x1   :  { %v16_v0 = vstv %s1911_s5 }
   0x2   :  { %17 = vst [vmem:[#allocation4] sm:$0x1] %v16_v0 }
   0x3   :  { %18 = vsyncpa [#allocation6], 0  ;;  %v38_v1 = vld [vmem:[%s1907_s1] sm:$0xff]  ;;  %vm46_vm0 = vcmask 64512   ;;  %v37_v3 = vld [vmem:[%s1906_s0 + $0x8] sm:$0xff]  ;;  %v1645_v7 = vmov 0.0|0.0  }
   0x4   :  { %v36_v2 = vld [vmem:[%s1906_s0] sm:$0xff]  ;;  %1366 = vmatprep.subr.mxu0 %v38_v1  ;;  %v183_v5 = vld [vmem:[%s1908_s2 + $0x8] sm:$0xff]  ;;  %v184_v6 = vld [vmem:[%s1908_s2 + $0x10] sm:$0xff]  ;;  %1481 = vmatprep.subr.bf16.mxu1 %v1645_v7 }
   0x5   :  { %1368 = vmatprep.mubr.msk.f32.mxu0 %vm46_vm0, %v36_v2  ;;  %v182_v4 = vld [vmem:[%s1908_s2] sm:$0xff]  ;;  %1367 = vmatpush3.msra.mxu0 %v38_v1  ;;  %v185_v9 = vld [vmem:[%s1908_s2 + $0x18] sm:$0xff] }
   0x6   :  { %v1730_v8 = vpack.c.bf16 %v183_v5, %v182_v4 }
   0x7   :  { %19 = vsyncpa [#allocation8], 0  ;;  %1369 = vmatmul.mubr.msk.f32.vlgmr.msra.gmra.mrb[0].mxu0 %vm46_vm0, %v37_v3  ;;  %vm1646_vm1 = vmmov 0   ;;  %v1647_v10 = vmov 0.0   ;;  %v1738_v11 = vpack.c.bf16 %v185_v9, %v184_v6  ;;  %1487 = vmatprep.subr.bf16.mxu0 %v1645_v7  ;;  %v186_v12 = vld [vmem:[%s1912_s6] sm:$0x3] }
   0x8   :  { %1379 = vmatprep.mubr.msk.f32.mxu1 %vm1646_vm1, %v1647_v10  ;;  %1483 = vmatpush3.bf16.msra.mxu1 %v1730_v8  ;;  %vm189_vm2 = vcmask 261120   ;;  %v1282_v13 = vld [vmem:[%s1909_s3] ss:$0 sm:$0xff]  ;;  %vm131_vm3 = vcmask 1040384   ;;  %s1648_s3 = smov 64   ;;  %s1649_s30 = smov 32  }
   0x9   :  { %1484 = vmatprep.subr.bf16.mxu1 %v1645_v7  ;;  %1489 = vmatpush3.bf16.msra.mxu0 %v1730_v8  ;;  %v187_v50 = vld [vmem:[%s1913_s7] sm:$0x3]  ;;  %vm297_vm4 = vcmask 254976   ;;  %s1650_s7 = smov 96   ;;  %vm1068_vm5 = vcmask 1041409   ;;  %vm1071_vm6 = vcmask 1042434  }
   0xa   :  { %1490 = vmatprep.subr.bf16.mxu0 %v1645_v7  ;;  %1390 = vmatprep.mubr.msk.f32.mxu0 %vm1646_vm1, %v1647_v10  ;;  %vm1074_vm7 = vcmask 1043459   ;;  %vm1077_vm8 = vcmask 1044484   ;;  %vm1080_vm9 = vcmask 1045509   ;;  %vm1083_vm10 = vcmask 1046534   ;;  %s1652_s20 = smov [#allocation7]  }
   0xb   :  { %vm1086_vm11 = vcmask 1047559   ;;  %s1268_s21 = sshll.u32 %s1652_s20, 4  ;;  %s1269_s21 = int_to_ptr.vmem [resolvable:$true] %s1268_s21 }
   0xc   :  { %1486 = vmatpush3.bf16.msra.mxu1 %v1738_v11 }
   0xd   :  { %1492 = vmatpush3.bf16.msra.mxu0 %v1738_v11  ;;  %1493 = vmatprep.subr.bf16.mxu1 %v1645_v7 }
   0xe   :  { %1499 = vmatprep.subr.bf16.mxu0 %v1645_v7 }
   0xf   :  { %1380 = vmatmul.mubr.msk.f32.vlgmr.msra.gmra.mrb[0].mxu1 %vm189_vm2, %v186_v12 }
  0x10   :  { %1495 = vmatpush3.bf16.msra.mxu1 %v1730_v8  ;;  %1401 = vmatprep.mubr.msk.f32.mxu1 %vm1646_vm1, %v1647_v10 }
  0x11   :  { %1496 = vmatprep.subr.bf16.mxu1 %v1645_v7 }
  0x14   :  { %1498 = vmatpush3.bf16.msra.mxu1 %v1738_v11 }
  0x15   :  { %1505 = vmatprep.subr.bf16.mxu1 %v1645_v7 }
  0xda   :  { %v1370_v14 = vpop.f32.mrb[0].mxu0 }
  0xdb   :  { %v125_v15 = vadd.f32 %v1370_v14, %v1282_v13  ;;  %v119_v16 = vpop.f32.mrb[1].mxu0 }
  0xdc   :  { %v120_v17 = vadd.f32 %v1282_v13, %v119_v16 }
  0xdd   :  { %v129_v18 = vrot.slane %v125_v15, 7  ;;  %v142_v19 = vrot.slane %v125_v15, 1  ;;  %v149_v20 = vrot.slane %v125_v15, 2  ;;  %v156_v21 = vrot.slane %v125_v15, 3 }
  0xde   :  { %v163_v22 = vrot.slane %v125_v15, 4  ;;  %v170_v23 = vrot.slane %v125_v15, 5  ;;  %v177_v24 = vrot.slane %v125_v15, 6  ;;  %v135_v25 = vrot.slane %v120_v17, 1 }
  0xdf   :  { %v132_v26 = vsel %vm131_vm3, %v120_v17, %v129_v18  ;;  %v140_v27 = vrot.slane %v120_v17, 2  ;;  %v147_v28 = vrot.slane %v120_v17, 3  ;;  %v154_v29 = vrot.slane %v120_v17, 4 }
  0xe0   :  { %133 = vst [vmem:[#allocation2] sm:$0x3] %v132_v26  ;;  %v161_v30 = vrot.slane %v120_v17, 5  ;;  %v168_v31 = vrot.slane %v120_v17, 6  ;;  %v175_v32 = vrot.slane %v120_v17, 7  ;;  %v137_v33 = vsel %vm131_vm3, %v135_v25, %v125_v15 }
  0xe1   :  { %139 = vst [vmem:[#allocation2 + $0x2] sm:$0x3] %v137_v33  ;;  %v144_v34 = vsel %vm131_vm3, %v140_v27, %v142_v19  ;;  %v151_v35 = vsel %vm131_vm3, %v147_v28, %v149_v20  ;;  %v158_v36 = vsel %vm131_vm3, %v154_v29, %v156_v21 }
  0xe2   :  { %v259_v37 = vpop.f32.mrb[0].mxu1  ;;  %146 = vst [vmem:[#allocation2 + $0x4] sm:$0x3] %v144_v34  ;;  %153 = vst [vmem:[#allocation2 + $0x6] sm:$0x3] %v151_v35  ;;  %v165_v38 = vsel %vm131_vm3, %v161_v30, %v163_v22  ;;  %v172_v39 = vsel %vm131_vm3, %v168_v31, %v170_v23  ;;  %v179_v40 = vsel %vm131_vm3, %v175_v32, %v177_v24 }
  0xe3   :  { %160 = vst [vmem:[#allocation2 + $0x8] sm:$0x3] %v158_v36  ;;  %v1381_v41 = vpop.f32.mrb[1].mxu1  ;;  %167 = vst [vmem:[#allocation2 + $0xa] sm:$0x3] %v165_v38 }
  0xe4   :  { %174 = vst [vmem:[#allocation2 + $0xc] sm:$0x3] %v172_v39  ;;  %181 = vst [vmem:[#allocation2 + $0xe] sm:$0x3] %v179_v40 }
  0xe7   :  { %v188_v42 = vld [vmem:[#allocation2] sm:$0x3] }
  0xe8   :  { %v263_v43 = vadd.f32 %v259_v37, %v188_v42  ;;  %v299_v61 = vld [vmem:[#allocation2 + $0x2] sm:$0x3] }
  0xe9   :  { %v404_v20 = vld [vmem:[#allocation2 + $0x4] sm:$0x3]  ;;  %v509_v39 = vld [vmem:[#allocation2 + $0x6] sm:$0x3] }
  0xea   :  { %v1286_v44 = vmul.f32 -1.442695, %v263_v43 }
  0xec   :  { %1549 = vpow2.f32 %v1286_v44 }
  0xf6   :  { %v1550_v45 = vpop.eup %1549 }
  0xf7   :  { %v267_v46 = vadd.f32 1.0, %v1550_v45 }
  0xf9   :  { %1551 = vrcp.f32 %v267_v46 }
 0x103   :  { %v1552_v47 = vpop.eup %1551 }
 0x104   :  { %v270_v48 = vmul.f32 2.0, %v1552_v47 }
 0x106   :  { %v1287_v49 = vadd.f32 -1.0, %v270_v48 }
 0x108   :  { %278 = vrot.lane.b32.xlu0 %v1287_v49, %s1648_s3 }
 0x10c   :  { %273 = vrot.lane.b32.xlu0 %v187_v50, %s1649_s30 }
 0x17a   :  { %v279_v51 = vpop.permute.xlu0 %278 }
 0x17b   :  { %v281_v52 = vmul.f32 %v1552_v47, %v279_v51 }
 0x17d   :  { %283 = vrot.lane.b32.xlu1 %v281_v52, %s1649_s30 }
 0x17e   :  { %v274_v53 = vpop.permute.xlu0 %273 }
 0x17f   :  { %v276_v54 = vmul.f32 %v1552_v47, %v274_v53 }
 0x1ef   :  { %v284_v55 = vpop.permute.xlu1 %283 }
 0x1f0   :  { %v286_v56 = vadd.f32 %v284_v55, %v276_v54 }
 0x1f2   :  { %1553 = vtanh.f32 %v286_v56 }
 0x1fc   :  { %v1554_v57 = vpop.eup %1553 }
 0x1fd   :  { %289 = vrot.lane.b32.xlu1 %v1554_v57, %s1648_s3 }
 0x26f   :  { %v290_v58 = vpop.permute.xlu1 %289 }
 0x270   :  { %v292_v59 = vmul.f32 %v1552_v47, %v290_v58  ;;  %v614_v58 = vld [vmem:[#allocation2 + $0x8] sm:$0x3] }
 0x272   :  { %294 = vrot.lane.b32.xlu0 %v292_v59, %s1649_s30 }
 0x2e4   :  { %v295_v60 = vpop.permute.xlu0 %294 }
 0x2e5   :  { %298 = vst.msk [vmem:[#allocation3] sm:$0x3] %vm297_vm4, %v295_v60  ;;  %1391 = vmatmul.mubr.msk.f32.vlgmr.msra.gmra.mrb[2].mxu0 %vm189_vm2, %v295_v60 }
 0x2e6   :  { %1501 = vmatpush3.bf16.msra.mxu0 %v1730_v8  ;;  %1412 = vmatprep.mubr.msk.f32.mxu0 %vm1646_vm1, %v1647_v10 }
 0x2e7   :  { %1502 = vmatprep.subr.bf16.mxu0 %v1645_v7 }
 0x2ea   :  { %1504 = vmatpush3.bf16.msra.mxu0 %v1738_v11 }
 0x2eb   :  { %1511 = vmatprep.subr.bf16.mxu0 %v1645_v7 }
 0x3b8   :  { %v368_v62 = vpop.f32.mrb[2].mxu0 }
 0x3b9   :  { %v372_v63 = vadd.f32 %v368_v62, %v299_v61  ;;  %v1392_v0 = vpop.f32.mrb[3].mxu0 }
 0x3bb   :  { %v1289_v1 = vmul.f32 -1.442695, %v372_v63 }
 0x3bd   :  { %1555 = vpow2.f32 %v1289_v1 }
 0x3c7   :  { %v1556_v2 = vpop.eup %1555 }
 0x3c8   :  { %v376_v3 = vadd.f32 1.0, %v1556_v2 }
 0x3ca   :  { %1557 = vrcp.f32 %v376_v3 }
 0x3d4   :  { %v1558_v4 = vpop.eup %1557 }
 0x3d5   :  { %v379_v5 = vmul.f32 2.0, %v1558_v4  ;;  %v381_v13 = vmul.f32 %v1558_v4, %v286_v56 }
 0x3d7   :  { %v1290_v6 = vadd.f32 -1.0, %v379_v5 }
 0x3d9   :  { %383 = vrot.lane.b32.xlu1 %v1290_v6, %s1648_s3 }
 0x44b   :  { %v384_v9 = vpop.permute.xlu1 %383 }
 0x44c   :  { %v386_v12 = vmul.f32 %v1558_v4, %v384_v9 }
 0x44e   :  { %388 = vrot.lane.b32.xlu0 %v386_v12, %s1649_s30 }
 0x4c0   :  { %v389_v14 = vpop.permute.xlu0 %388 }
 0x4c1   :  { %v391_v15 = vadd.f32 %v389_v14, %v381_v13 }
 0x4c3   :  { %1559 = vtanh.f32 %v391_v15 }
 0x4cd   :  { %v1560_v16 = vpop.eup %1559 }
 0x4ce   :  { %394 = vrot.lane.b32.xlu1 %v1560_v16, %s1648_s3 }
 0x540   :  { %v395_v17 = vpop.permute.xlu1 %394 }
 0x541   :  { %v397_v18 = vmul.f32 %v1558_v4, %v395_v17  ;;  %v719_v17 = vld [vmem:[#allocation2 + $0xa] sm:$0x3] }
 0x543   :  { %399 = vrot.lane.b32.xlu0 %v397_v18, %s1649_s30 }
 0x5b5   :  { %v400_v19 = vpop.permute.xlu0 %399 }
 0x5b6   :  { %403 = vst.msk [vmem:[#allocation3 + $0x2] sm:$0x3] %vm297_vm4, %v400_v19  ;;  %1402 = vmatmul.mubr.msk.f32.vlgmr.msra.gmra.mrb[2].mxu1 %vm189_vm2, %v400_v19 }
 0x5b7   :  { %1507 = vmatpush3.bf16.msra.mxu1 %v1730_v8  ;;  %1423 = vmatprep.mubr.msk.f32.mxu1 %vm1646_vm1, %v1647_v10 }
 0x5b8   :  { %1508 = vmatprep.subr.bf16.mxu1 %v1645_v7 }
 0x5bb   :  { %1510 = vmatpush3.bf16.msra.mxu1 %v1738_v11 }
 0x5bc   :  { %1517 = vmatprep.subr.bf16.mxu1 %v1645_v7 }
 0x689   :  { %v473_v21 = vpop.f32.mrb[2].mxu1 }
 0x68a   :  { %v477_v22 = vadd.f32 %v473_v21, %v404_v20  ;;  %v1403_v23 = vpop.f32.mrb[3].mxu1 }
 0x68c   :  { %v1292_v24 = vmul.f32 -1.442695, %v477_v22 }
 0x68e   :  { %1561 = vpow2.f32 %v1292_v24 }
 0x698   :  { %v1562_v25 = vpop.eup %1561 }
 0x699   :  { %v481_v26 = vadd.f32 1.0, %v1562_v25 }
 0x69b   :  { %1563 = vrcp.f32 %v481_v26 }
 0x6a5   :  { %v1564_v27 = vpop.eup %1563 }
 0x6a6   :  { %v484_v28 = vmul.f32 2.0, %v1564_v27  ;;  %v486_v32 = vmul.f32 %v1564_v27, %v391_v15 }
 0x6a8   :  { %v1293_v29 = vadd.f32 -1.0, %v484_v28 }
 0x6aa   :  { %488 = vrot.lane.b32.xlu1 %v1293_v29, %s1648_s3 }
 0x71c   :  { %v489_v30 = vpop.permute.xlu1 %488 }
 0x71d   :  { %v491_v31 = vmul.f32 %v1564_v27, %v489_v30 }
 0x71f   :  { %493 = vrot.lane.b32.xlu0 %v491_v31, %s1649_s30 }
 0x791   :  { %v494_v33 = vpop.permute.xlu0 %493 }
 0x792   :  { %v496_v34 = vadd.f32 %v494_v33, %v486_v32 }
 0x794   :  { %1565 = vtanh.f32 %v496_v34 }
 0x79e   :  { %v1566_v35 = vpop.eup %1565 }
 0x79f   :  { %499 = vrot.lane.b32.xlu1 %v1566_v35, %s1648_s3 }
 0x811   :  { %v500_v36 = vpop.permute.xlu1 %499 }
 0x812   :  { %v502_v37 = vmul.f32 %v1564_v27, %v500_v36 }
 0x814   :  { %504 = vrot.lane.b32.xlu0 %v502_v37, %s1649_s30 }
 0x886   :  { %v505_v38 = vpop.permute.xlu0 %504 }
 0x887   :  { %508 = vst.msk [vmem:[#allocation3 + $0x4] sm:$0x3] %vm297_vm4, %v505_v38  ;;  %1413 = vmatmul.mubr.msk.f32.vlgmr.msra.gmra.mrb[4].mxu0 %vm189_vm2, %v505_v38 }
 0x888   :  { %1513 = vmatpush3.bf16.msra.mxu0 %v1730_v8  ;;  %1434 = vmatprep.mubr.msk.f32.mxu0 %vm1646_vm1, %v1647_v10 }
 0x889   :  { %1514 = vmatprep.subr.bf16.mxu0 %v1645_v7 }
 0x88c   :  { %1516 = vmatpush3.bf16.msra.mxu0 %v1738_v11 }
 0x88d   :  { %1523 = vmatprep.subr.bf16.mxu0 %v1645_v7 }
 0x95a   :  { %v578_v40 = vpop.f32.mrb[4].mxu0 }
 0x95b   :  { %v582_v41 = vadd.f32 %v578_v40, %v509_v39  ;;  %v1414_v42 = vpop.f32.mrb[5].mxu0 }
 0x95d   :  { %v1295_v43 = vmul.f32 -1.442695, %v582_v41 }
 0x95f   :  { %1567 = vpow2.f32 %v1295_v43 }
 0x969   :  { %v1568_v44 = vpop.eup %1567 }
 0x96a   :  { %v586_v45 = vadd.f32 1.0, %v1568_v44 }
 0x96c   :  { %1569 = vrcp.f32 %v586_v45 }
 0x976   :  { %v1570_v46 = vpop.eup %1569 }
 0x977   :  { %v589_v47 = vmul.f32 2.0, %v1570_v46  ;;  %v591_v51 = vmul.f32 %v1570_v46, %v496_v34  ;;  %v824_v34 = vld [vmem:[#allocation2 + $0xc] sm:$0x3] }
 0x979   :  { %v1296_v48 = vadd.f32 -1.0, %v589_v47 }
 0x97b   :  { %593 = vrot.lane.b32.xlu1 %v1296_v48, %s1648_s3 }
 0x9ed   :  { %v594_v49 = vpop.permute.xlu1 %593 }
 0x9ee   :  { %v596_v50 = vmul.f32 %v1570_v46, %v594_v49 }
 0x9f0   :  { %598 = vrot.lane.b32.xlu0 %v596_v50, %s1649_s30 }
 0xa62   :  { %v599_v52 = vpop.permute.xlu0 %598 }
 0xa63   :  { %v601_v53 = vadd.f32 %v599_v52, %v591_v51 }
 0xa65   :  { %1571 = vtanh.f32 %v601_v53 }
 0xa6f   :  { %v1572_v54 = vpop.eup %1571 }
 0xa70   :  { %604 = vrot.lane.b32.xlu1 %v1572_v54, %s1648_s3 }
 0xae2   :  { %v605_v55 = vpop.permute.xlu1 %604 }
 0xae3   :  { %v607_v56 = vmul.f32 %v1570_v46, %v605_v55 }
 0xae5   :  { %609 = vrot.lane.b32.xlu0 %v607_v56, %s1649_s30 }
 0xb57   :  { %v610_v57 = vpop.permute.xlu0 %609 }
 0xb58   :  { %613 = vst.msk [vmem:[#allocation3 + $0x6] sm:$0x3] %vm297_vm4, %v610_v57  ;;  %1424 = vmatmul.mubr.msk.f32.vlgmr.msra.gmra.mrb[4].mxu1 %vm189_vm2, %v610_v57 }
 0xb59   :  { %1519 = vmatpush3.bf16.msra.mxu1 %v1730_v8  ;;  %1445 = vmatprep.mubr.msk.f32.mxu1 %vm1646_vm1, %v1647_v10 }
 0xb5a   :  { %1520 = vmatprep.subr.bf16.mxu1 %v1645_v7 }
 0xb5d   :  { %1522 = vmatpush3.bf16.msra.mxu1 %v1738_v11 }
 0xb5e   :  { %1529 = vmatprep.subr.bf16.mxu1 %v1645_v7 }
 0xc2b   :  { %v683_v59 = vpop.f32.mrb[4].mxu1 }
 0xc2c   :  { %v687_v60 = vadd.f32 %v683_v59, %v614_v58  ;;  %v1425_v61 = vpop.f32.mrb[5].mxu1 }
 0xc2e   :  { %v1298_v62 = vmul.f32 -1.442695, %v687_v60 }
 0xc30   :  { %1573 = vpow2.f32 %v1298_v62 }
 0xc3a   :  { %v1574_v63 = vpop.eup %1573 }
 0xc3b   :  { %v691_v0 = vadd.f32 1.0, %v1574_v63 }
 0xc3d   :  { %1575 = vrcp.f32 %v691_v0 }
 0xc47   :  { %v1576_v1 = vpop.eup %1575 }
 0xc48   :  { %v694_v2 = vmul.f32 2.0, %v1576_v1  ;;  %v696_v6 = vmul.f32 %v1576_v1, %v601_v53  ;;  %v929_v53 = vld [vmem:[#allocation2 + $0xe] sm:$0x3] }
 0xc4a   :  { %v1299_v3 = vadd.f32 -1.0, %v694_v2 }
 0xc4c   :  { %698 = vrot.lane.b32.xlu1 %v1299_v3, %s1648_s3 }
 0xcbe   :  { %v699_v4 = vpop.permute.xlu1 %698 }
 0xcbf   :  { %v701_v5 = vmul.f32 %v1576_v1, %v699_v4  ;;  %v1048_v4 = vld [vmem:[%s1910_s4] sm:$0xff] }
 0xcc1   :  { %703 = vrot.lane.b32.xlu0 %v701_v5, %s1649_s30  ;;  %v1049_v5 = vld [vmem:[%s1910_s4 + $0x8] sm:$0xff] }
 0xd33   :  { %v704_v9 = vpop.permute.xlu0 %703 }
 0xd34   :  { %v706_v12 = vadd.f32 %v704_v9, %v696_v6  ;;  %v1050_v6 = vld [vmem:[%s1910_s4 + $0x10] sm:$0xff]  ;;  %v1530_v9 = vpack.c.bf16 %v1049_v5, %v1048_v4 }
 0xd36   :  { %1577 = vtanh.f32 %v706_v12 }
 0xd40   :  { %v1578_v13 = vpop.eup %1577 }
 0xd41   :  { %709 = vrot.lane.b32.xlu1 %v1578_v13, %s1648_s3 }
 0xdb3   :  { %v710_v14 = vpop.permute.xlu1 %709 }
 0xdb4   :  { %v712_v15 = vmul.f32 %v1576_v1, %v710_v14 }
 0xdb6   :  { %714 = vrot.lane.b32.xlu0 %v712_v15, %s1649_s30 }
 0xe28   :  { %v715_v16 = vpop.permute.xlu0 %714 }
 0xe29   :  { %718 = vst.msk [vmem:[#allocation3 + $0x8] sm:$0x3] %vm297_vm4, %v715_v16  ;;  %1435 = vmatmul.mubr.msk.f32.vlgmr.msra.gmra.mrb[6].mxu0 %vm189_vm2, %v715_v16 }
 0xe2a   :  { %1525 = vmatpush3.bf16.msra.mxu0 %v1730_v8  ;;  %1456 = vmatprep.mubr.msk.f32.mxu0 %vm1646_vm1, %v1647_v10 }
 0xe2b   :  { %1526 = vmatprep.subr.bf16.mxu0 %v1645_v7 }
 0xe2e   :  { %1528 = vmatpush3.bf16.msra.mxu0 %v1738_v11 }
 0xe2f   :  { %1535 = vmatprep.subr.bf16.mxu0 %v1645_v7 }
 0xefc   :  { %v788_v18 = vpop.f32.mrb[6].mxu0 }
 0xefd   :  { %v792_v19 = vadd.f32 %v788_v18, %v719_v17  ;;  %v1436_v20 = vpop.f32.mrb[7].mxu0  ;;  %v1041_v17 = vld [vmem:[#allocation3 + $0x2] sm:$0x3]  ;;  %v1040_v18 = vld [vmem:[#allocation3] sm:$0x3] }
 0xeff   :  { %v1301_v21 = vmul.f32 -1.442695, %v792_v19  ;;  %v1042_v19 = vld [vmem:[#allocation3 + $0x4] sm:$0x3] }
 0xf01   :  { %1579 = vpow2.f32 %v1301_v21  ;;  %v1043_v21 = vld [vmem:[#allocation3 + $0x6] sm:$0x3] }
 0xf0b   :  { %v1580_v22 = vpop.eup %1579 }
 0xf0c   :  { %v796_v23 = vadd.f32 1.0, %v1580_v22  ;;  %v1067_v22 = vrot.slane %v1041_v17, 7 }
 0xf0e   :  { %1581 = vrcp.f32 %v796_v23  ;;  %v1070_v23 = vrot.slane %v1042_v19, 6 }
 0xf18   :  { %v1582_v24 = vpop.eup %1581 }
 0xf19   :  { %v799_v8 = vmul.f32 2.0, %v1582_v24  ;;  %v801_v11 = vmul.f32 %v1582_v24, %v706_v12  ;;  %v1051_v12 = vld [vmem:[%s1910_s4 + $0x18] sm:$0xff]  ;;  %s1651_s4 = smov [#allocation5]  }
 0xf1a   :  { %v1533_v13 = vpack.c.bf16 %v1051_v12, %v1050_v6  ;;  %s1258_s19 = sshll.u32 %s1651_s4, 4  ;;  %s1259_s19 = int_to_ptr.vmem [resolvable:$true] %s1258_s19 }
 0xf1b   :  { %v1302_v25 = vadd.f32 -1.0, %v799_v8  ;;  %s1597_s22 = scalar_lea.vmem %s1259_s19, 32  ;;  %p1602_p1 = scmp.lt.s32.totalorder %s1259_s19, %s1259_s19 }
 0xf1c   :  { %p1598_p0 = scmp.ne.s32.totalorder %s1259_s19, %s1597_s22  ;;  %p1603_p2 = scmp.lt.s32.totalorder %s1597_s22, %s1597_s22 }
 0xf1d   :  { %803 = vrot.lane.b32.xlu1 %v1302_v25, %s1648_s3  ;;  %v1164_v25 = vrot.slane %v1042_v19, 7 }
 0xf1e   :  { %p1604_p3 = por %p1603_p2, %p1602_p1 }
 0xf20   :  { %p1605_p4 = pnand %p1604_p3, %p1598_p0 }
 0xf8f   :  { %v804_v26 = vpop.permute.xlu1 %803 }
 0xf90   :  { %v806_v27 = vmul.f32 %v1582_v24, %v804_v26 }
 0xf92   :  { %808 = vrot.lane.b32.xlu0 %v806_v27, %s1649_s30  ;;  %v1073_v27 = vrot.slane %v1043_v21, 5 }
0x1004   :  { %v809_v28 = vpop.permute.xlu0 %808 }
0x1005   :  { %v811_v29 = vadd.f32 %v809_v28, %v801_v11  ;;  %v1166_v28 = vrot.slane %v1043_v21, 6 }
0x1007   :  { %1583 = vtanh.f32 %v811_v29 }
0x1011   :  { %v1584_v30 = vpop.eup %1583 }
0x1012   :  { %814 = vrot.lane.b32.xlu1 %v1584_v30, %s1648_s3 }
0x1084   :  { %v815_v31 = vpop.permute.xlu1 %814 }
0x1085   :  { %v817_v32 = vmul.f32 %v1582_v24, %v815_v31  ;;  %v1162_v24 = vrot.slane %v1040_v18, 1 }
0x1087   :  { %819 = vrot.lane.b32.xlu0 %v817_v32, %s1649_s30  ;;  %v1163_v11 = vsel %vm1068_vm5, %v1041_v17, %v1162_v24 }
0x10f9   :  { %v820_v33 = vpop.permute.xlu0 %819 }
0x10fa   :  { %823 = vst.msk [vmem:[#allocation3 + $0xa] sm:$0x3] %vm297_vm4, %v820_v33  ;;  %1446 = vmatmul.mubr.msk.f32.vlgmr.msra.gmra.mrb[6].mxu1 %vm189_vm2, %v820_v33 }
0x10fb   :  { %1467 = vmatprep.mubr.msk.f32.mxu1 %vm1646_vm1, %v1647_v10  ;;  %1531 = vmatpush3.bf16.msra.mxu1 %v1530_v9 }
0x10fc   :  { %1532 = vmatprep.subr.bf16.mxu1 %v1645_v7 }
0x10ff   :  { %1534 = vmatpush3.bf16.msra.mxu1 %v1533_v13 }
0x1101   :  { %v1045_v8 = vld [vmem:[#allocation3 + $0xa] sm:$0x3] }
0x1102   :  { %v1079_v33 = vrot.slane %v1045_v8, 3 }
0x11cd   :  { %v893_v35 = vpop.f32.mrb[6].mxu1 }
0x11ce   :  { %v897_v36 = vadd.f32 %v893_v35, %v824_v34  ;;  %v1447_v37 = vpop.f32.mrb[7].mxu1  ;;  %v1170_v34 = vrot.slane %v1045_v8, 4 }
0x11d0   :  { %v1304_v38 = vmul.f32 -1.442695, %v897_v36  ;;  %v1165_v36 = vsel %vm1071_vm6, %v1164_v25, %v1163_v11 }
0x11d2   :  { %1585 = vpow2.f32 %v1304_v38 }
0x11dc   :  { %v1586_v39 = vpop.eup %1585 }
0x11dd   :  { %v901_v40 = vadd.f32 1.0, %v1586_v39  ;;  %v1167_v39 = vsel %vm1074_vm7, %v1166_v28, %v1165_v36 }
0x11df   :  { %1587 = vrcp.f32 %v901_v40 }
0x11e9   :  { %v1588_v41 = vpop.eup %1587 }
0x11ea   :  { %v904_v42 = vmul.f32 2.0, %v1588_v41  ;;  %v906_v46 = vmul.f32 %v1588_v41, %v811_v29  ;;  %v1069_v29 = vsel %vm1068_vm5, %v1067_v22, %v1040_v18 }
0x11eb   :  { %v1072_v32 = vsel %vm1071_vm6, %v1070_v23, %v1069_v29 }
0x11ec   :  { %v1305_v43 = vadd.f32 -1.0, %v904_v42  ;;  %v1075_v38 = vsel %vm1074_vm7, %v1073_v27, %v1072_v32 }
0x11ee   :  { %908 = vrot.lane.b32.xlu1 %v1305_v43, %s1648_s3 }
0x1260   :  { %v909_v44 = vpop.permute.xlu1 %908 }
0x1261   :  { %v911_v45 = vmul.f32 %v1588_v41, %v909_v44 }
0x1263   :  { %913 = vrot.lane.b32.xlu0 %v911_v45, %s1649_s30 }
0x12d5   :  { %v914_v47 = vpop.permute.xlu0 %913 }
0x12d6   :  { %v916_v48 = vadd.f32 %v914_v47, %v906_v46 }
0x12d8   :  { %1589 = vtanh.f32 %v916_v48 }
0x12e2   :  { %v1590_v49 = vpop.eup %1589 }
0x12e3   :  { %919 = vrot.lane.b32.xlu1 %v1590_v49, %s1648_s3 }
0x1355   :  { %v920_v50 = vpop.permute.xlu1 %919 }
0x1356   :  { %v922_v51 = vmul.f32 %v1588_v41, %v920_v50 }
0x1358   :  { %924 = vrot.lane.b32.xlu0 %v922_v51, %s1649_s30 }
0x13ca   :  { %v925_v52 = vpop.permute.xlu0 %924 }
0x13cb   :  { %928 = vst.msk [vmem:[#allocation3 + $0xc] sm:$0x3] %vm297_vm4, %v925_v52  ;;  %1457 = vmatmul.mubr.msk.f32.vlgmr.msra.gmra.mrb[8].mxu0 %vm189_vm2, %v925_v52 }
0x13cc   :  { %1478 = vmatprep.mubr.msk.f32.mxu0 %vm1646_vm1, %v1647_v10  ;;  %1537 = vmatpush3.bf16.msra.mxu0 %v1530_v9 }
0x13cd   :  { %1538 = vmatprep.subr.bf16.mxu0 %v1645_v7  ;;  %v1044_v7 = vld [vmem:[#allocation3 + $0x8] sm:$0x3] }
0x13ce   :  { %v1076_v30 = vrot.slane %v1044_v7, 4  ;;  %v1168_v31 = vrot.slane %v1044_v7, 5 }
0x13d0   :  { %1540 = vmatpush3.bf16.msra.mxu0 %v1533_v13  ;;  %v1078_v41 = vsel %vm1077_vm8, %v1076_v30, %v1075_v38  ;;  %v1169_v42 = vsel %vm1077_vm8, %v1168_v31, %v1167_v39 }
0x13d1   :  { %v1081_v43 = vsel %vm1080_vm9, %v1079_v33, %v1078_v41  ;;  %v1171_v45 = vsel %vm1080_vm9, %v1170_v34, %v1169_v42 }
0x13d2   :  { %v1046_v26 = vld [vmem:[#allocation3 + $0xc] sm:$0x3] }
0x13d3   :  { %v1082_v35 = vrot.slane %v1046_v26, 2  ;;  %v1172_v37 = vrot.slane %v1046_v26, 3 }
0x13d5   :  { %v1084_v47 = vsel %vm1083_vm10, %v1082_v35, %v1081_v43 }
0x149e   :  { %v998_v54 = vpop.f32.mrb[8].mxu0 }
0x149f   :  { %v1002_v55 = vadd.f32 %v998_v54, %v929_v53  ;;  %v1458_v56 = vpop.f32.mrb[9].mxu0 }
0x14a1   :  { %v1307_v57 = vmul.f32 -1.442695, %v1002_v55 }
0x14a3   :  { %1591 = vpow2.f32 %v1307_v57 }
0x14ad   :  { %v1592_v58 = vpop.eup %1591 }
0x14ae   :  { %v1006_v59 = vadd.f32 1.0, %v1592_v58 }
0x14b0   :  { %1593 = vrcp.f32 %v1006_v59 }
0x14ba   :  { %v1594_v60 = vpop.eup %1593 }
0x14bb   :  { %v1009_v61 = vmul.f32 2.0, %v1594_v60  ;;  %v1011_v1 = vmul.f32 %v1594_v60, %v916_v48  ;;  %v1173_v48 = vsel %vm1083_vm10, %v1172_v37, %v1171_v45 }
0x14bd   :  { %v1308_v62 = vadd.f32 -1.0, %v1009_v61 }
0x14bf   :  { %1013 = vrot.lane.b32.xlu1 %v1308_v62, %s1648_s3 }
0x1531   :  { %v1014_v63 = vpop.permute.xlu1 %1013 }
0x1532   :  { %v1016_v0 = vmul.f32 %v1594_v60, %v1014_v63 }
0x1534   :  { %1018 = vrot.lane.b32.xlu0 %v1016_v0, %s1649_s30 }
0x15a6   :  { %v1019_v10 = vpop.permute.xlu0 %1018 }
0x15a7   :  { %v1021_v2 = vadd.f32 %v1019_v10, %v1011_v1 }
0x15a9   :  { %1595 = vtanh.f32 %v1021_v2 }
0x15b3   :  { %v1596_v3 = vpop.eup %1595 }
0x15b4   :  { %1024 = vrot.lane.b32.xlu1 %v1596_v3, %s1648_s3 }
0x15b8   :  { %1036 = vrot.lane.b32.xlu1 %v1021_v2, %s1650_s7 }
0x1626   :  { %v1025_v14 = vpop.permute.xlu1 %1024 }
0x1627   :  { %v1027_v15 = vmul.f32 %v1594_v60, %v1025_v14 }
0x1629   :  { %1029 = vrot.lane.b32.xlu0 %v1027_v15, %s1649_s30 }
0x162a   :  { %v1037_v16 = vpop.permute.xlu1 %1036 }
0x162b   :  { %1039 = vst.msk [vmem:[#allocation7] sm:$0x3] %vm297_vm4, %v1037_v16 }
0x169b   :  { %v1030_v20 = vpop.permute.xlu0 %1029 }
0x169c   :  { %1033 = vst.msk [vmem:[#allocation3 + $0xe] sm:$0x3] %vm297_vm4, %v1030_v20  ;;  %1034 = vst.msk [vmem:[#allocation5] sm:$0x3] %vm297_vm4, %v1030_v20 }
0x16a3   :  { %v1047_v40 = vld [vmem:[#allocation3 + $0xe] sm:$0x3] }
0x16a4   :  { %v1085_v44 = vrot.slane %v1047_v40, 1  ;;  %v1174_v46 = vrot.slane %v1047_v40, 2 }
0x16a6   :  { %v1087_v49 = vsel %vm1086_vm11, %v1085_v44, %v1084_v47  ;;  %v1175_v50 = vsel %vm1086_vm11, %v1174_v46, %v1173_v48 }
0x16a7   :  { %1468 = vmatmul.mubr.msk.f32.vlgmr.msra.gmra.mrb[8].mxu1 %vm189_vm2, %v1087_v49  ;;  %1479 = vmatmul.mubr.msk.f32.vlgmr.msra.gmra.mrb[10].mxu0 %vm189_vm2, %v1175_v50 }
0x16a8   :  { %1608 = shalt.err (!%p1605_p4)
}
0x16a9   :  { %s1609_s1 = scalar_lea.hbm %s1915_s9, 32 }
0x16aa   :  { %p1610_p5 = scmp.ne.s32.totalorder %s1915_s9, %s1609_s1  ;;  %p1613_p6 = scmp.lt.u32.totalorder %s1609_s1, %s1915_s9 }
0x16ac   :  { %p1615_p7 = pnand %p1613_p6, %p1610_p5 }
0x16ae   :  { %1618 = shalt.err (!%p1615_p7)
}
0x16af   :  { %1261 = dma.vmem_to_hbm [thread:$0]  %s1259_s19, 32, %s1915_s9, [#allocation6]  }
0x16b0   :  { %s1619_s27 = scalar_lea.vmem %s1269_s21, 32  ;;  %p1624_p9 = scmp.lt.s32.totalorder %s1269_s21, %s1269_s21 }
0x16b1   :  { %p1620_p8 = scmp.ne.s32.totalorder %s1269_s21, %s1619_s27  ;;  %p1625_p10 = scmp.lt.s32.totalorder %s1619_s27, %s1619_s27 }
0x16b3   :  { %p1626_p11 = por %p1625_p10, %p1624_p9 }
0x16b5   :  { %p1627_p12 = pnand %p1626_p11, %p1620_p8 }
0x16b7   :  { %1630 = shalt.err (!%p1627_p12)
}
0x16b8   :  { %s1631_s29 = scalar_lea.hbm %s1916_s10, 32 }
0x16b9   :  { %p1632_p13 = scmp.ne.s32.totalorder %s1916_s10, %s1631_s29  ;;  %p1635_p0 = scmp.lt.u32.totalorder %s1631_s29, %s1916_s10 }
0x16bb   :  { %p1637_p1 = pnand %p1635_p0, %p1632_p13 }
0x16bd   :  { %1640 = shalt.err (!%p1637_p1)
}
0x16be   :  { %1271 = dma.vmem_to_hbm [thread:$0]  %s1269_s21, 32, %s1916_s10, [#allocation8]   ;;  %v1309_v51 = vld [vmem:[#allocation4] ss:$0 sm:$0xff]  ;;  %vm1160_vm12 = vcmask 7168  }
0x177a   :  { %v1156_v52 = vpop.f32.mrb[8].mxu1  ;;  %v1244_v53 = vpop.f32.mrb[10].mxu0 }
0x177b   :  { %v1157_v54 = vadd.f32 %v1309_v51, %v1156_v52  ;;  %v1245_v55 = vadd.f32 %v1309_v51, %v1244_v53  ;;  %v1469_v56 = vpop.f32.mrb[9].mxu1  ;;  %v1480_v57 = vpop.f32.mrb[11].mxu0 }
0x177d   :  { %1161 = vst.msk [vmem:[%s1914_s8] sm:$0xff] %vm1160_vm12, %v1157_v54  ;;  %1312 = vst.msk [vmem:[%s1914_s8 + $0x8] sm:$0xff] %vm1160_vm12, %v1245_v55 }
0x177e   :  { %1641 = dma.done.wait [#allocation6], 32  }
0x177f   :  { %1642 = vsyncadd [#allocation6], 4294967264 }
0x1780   :  { %1643 = dma.done.wait [#allocation8], 32  }
0x1781   :  { %1644 = vsyncadd [#allocation8], 4294967264 }
0x1782   :  { %1280 = vsyncpa [#allocation6], 1 }
0x1783   :  { %1281 = vsyncpa [#allocation8], 1 }

</bundles_post_ra>
